<compile_context>
chip_gen: v7x
topology: tpu7x:2x2x1
jax: 0.10.0
libtpu: 0.0.40
codegen_flags: <defaults>
</compile_context>

<pallas_src>
import functools

import jax
import jax.numpy as jnp
from jax.experimental import pallas as pl
from jax.experimental.pallas import tpu as pltpu


def _round_up(x, m):
    return ((x + m - 1) // m) * m


def _cdiv(a, b):
    return -(-a // b)


def _cls_head_kernel(feat_ref, w1_ref, b1_ref, w2_ref, b2_ref, out_ref):
    # Two MXU matmuls on native (bf16) operands with f32 accumulation;
    # bias-add + tanh (EUP) in f32; single lane-dense store.
    h = jnp.dot(feat_ref[...], w1_ref[...], preferred_element_type=jnp.float32)
    h = jnp.tanh(h + b1_ref[...])
    y = jnp.dot(h.astype(w2_ref.dtype), w2_ref[...],
                preferred_element_type=jnp.float32)
    out_ref[...] = (y + b2_ref[...]).astype(out_ref.dtype)


def _resident_spec(shape):
    """BlockSpec for an operand whose block never changes across the grid.

    Single-buffered (pl.Buffered(1)) so the dead second pipeline buffer is not
    allocated (matters most under v7x's 64 MiB / 32 MiB-scoped VMEM).
    """
    index_map = lambda i: (0, 0)
    try:
        return pl.BlockSpec(shape, index_map, pipeline_mode=pl.Buffered(1))
    except TypeError:  # older jax without pipeline_mode: degrade gracefully
        return pl.BlockSpec(shape, index_map)


def _choose_batch_tile(B, row_floor):
    """Batch tile: full array for small B, else >= 2 blocks capped at 512 rows."""
    target = 512  # amortizes ~0.35 us/grid-step while staying VMEM-friendly on v7x
    if B <= max(row_floor, 128):
        return B  # one block == full array dims (always a legal block shape)
    nb = max(2, _cdiv(B, target))  # >= 2 blocks so "parallel" engages both TCs
    return _round_up(_cdiv(B, nb), row_floor)


def prepare_xlm_roberta_head_params(w_dense, b_dense, w_out, b_out,
                                    *, compute_dtype=jnp.bfloat16):
    """One-time weight preparation — hoisted out of the per-forward hot path.

    w_dense: [H, H], b_dense: [H], w_out: [H, L], b_out: [L]
    (weights pre-transposed to [in, out] vs. PyTorch nn.Linear).

    Casts matmul weights to `compute_dtype` for the MXU, zero-pads the label
    dim to a lane-dense multiple of 128, and stores biases as f32 [1, N].
    """
    if not (jnp.issubdtype(w_dense.dtype, jnp.floating)
            and jnp.issubdtype(w_out.dtype, jnp.floating)):
        raise ValueError("quantized integer weights are not supported; "
                         "pass floating-point (de-quantized) weights")
    H1, H2 = w_dense.shape
    H, L = w_out.shape
    assert H1 == H2 == H, "expected w_dense [H, H] and w_out [H, L]"

    Lp = max(128, _round_up(L, 128))
    w_dense_c = w_dense.astype(compute_dtype)
    w_out_p = (jnp.zeros((H, Lp), dtype=compute_dtype)
               .at[:, :L].set(w_out.astype(compute_dtype)))
    b_dense_row = b_dense.astype(jnp.float32).reshape(1, H)
    b_out_row = (jnp.zeros((1, Lp), dtype=jnp.float32)
                 .at[0, :L].set(b_out.astype(jnp.float32)))
    return dict(w_dense=w_dense_c, b_dense=b_dense_row,
                w_out=w_out_p, b_out=b_out_row, num_labels=L)


def xlm_roberta_classification_head(features, w_dense, b_dense, w_out, b_out,
                                    *, num_labels, out_dtype=None):
    """features: [B, H] (float). Weights from prepare_xlm_roberta_head_params.

    Returns [B, num_labels] in `out_dtype` (default: features.dtype).
    """
    B, H = features.shape
    Lp = w_out.shape[1]
    out_dtype = features.dtype if out_dtype is None else out_dtype
    compute_dtype = w_dense.dtype

    # Feed the MXU its native (bf16) dtype; f32 accumulation happens in-kernel.
    feats = features.astype(compute_dtype)

    # Dtype-aware batch tile floor (sublane packing: 8 rows f32, 16 bf16, 32 i8).
    row_floor = max(8, 32 // jnp.dtype(compute_dtype).itemsize)
    TB = _choose_batch_tile(B, row_floor)
    nb = _cdiv(B, TB)  # boundary block (if any) is masked by Pallas — no pad.

    itemsize = lambda a: a.size * a.dtype.itemsize
    cost = pl.CostEstimate(
        flops=2 * B * H * H + 2 * B * H * Lp,
        transcendentals=B * H,
        bytes_accessed=(itemsize(feats) + itemsize(w_dense) + itemsize(w_out)
                        + itemsize(b_dense) + itemsize(b_out)
                        + B * Lp * jnp.dtype(out_dtype).itemsize),
    )

    out_p = pl.pallas_call(
        _cls_head_kernel,
        out_shape=jax.ShapeDtypeStruct((B, Lp), out_dtype),
        grid=(nb,),
        in_specs=[
            pl.BlockSpec((TB, H), lambda i: (i, 0)),  # features tile (pipelined)
            _resident_spec((H, H)),                   # W_dense  (resident, 1 buf)
            _resident_spec((1, H)),                   # b_dense  (resident, f32)
            _resident_spec((H, Lp)),                  # W_out    (resident, padded)
            _resident_spec((1, Lp)),                  # b_out    (resident, f32)
        ],
        out_specs=pl.BlockSpec((TB, Lp), lambda i: (i, 0)),  # lane-dense store
        compiler_params=pltpu.CompilerParams(
            dimension_semantics=("parallel",)),       # shard batch across TCs
        cost_estimate=cost,
    )(feats, w_dense, b_dense, w_out, b_out)

    # TODO(synk): for small-batch serving (nb == 1) wall time ~= the one-shot
    # weight DMA; prefetch head weights into VMEM via a prior pallas_call
    # (cross-call future, P10) overlapped with the last encoder layer.
    return out_p[:, :num_labels]


if __name__ == "__main__":
    # Small config consistent with the module: hidden_size=128, num_labels=4.
    B, H, L = 8, 128, 4

    key = jax.random.PRNGKey(0)
    k_feat, k_w1, k_b1, k_w2, k_b2 = jax.random.split(key, 5)

    features = jax.random.normal(k_feat, (B, H), dtype=jnp.float32)
    # PyTorch shapes: dense [H,H]+[H], out_proj [L,H]+[L]; stored here
    # pre-transposed as [in, out].
    w_dense = jax.random.normal(k_w1, (H, H), dtype=jnp.float32) * 0.02
    b_dense = jax.random.normal(k_b1, (H,), dtype=jnp.float32) * 0.02
    w_out = jax.random.normal(k_w2, (H, L), dtype=jnp.float32) * 0.02
    b_out = jax.random.normal(k_b2, (L,), dtype=jnp.float32) * 0.02

    # One-time weight prep (bf16 cast / label-dim pad / bias reshape),
    # hoisted out of the per-forward path.
    params = prepare_xlm_roberta_head_params(w_dense, b_dense, w_out, b_out)

    fwd = jax.jit(functools.partial(xlm_roberta_classification_head,
                                    out_dtype=jnp.float32, **params))
    out = jax.block_until_ready(fwd(features))

    # Reference in plain JAX (f32). bf16 MXU operands -> loosened tolerance.
    ref = jnp.tanh(features @ w_dense + b_dense) @ w_out + b_out
    assert out.shape == (B, L)
    assert jnp.allclose(out, ref, atol=2e-2, rtol=2e-2), (
        float(jnp.max(jnp.abs(out - ref))))

    print("KERNEL_OK")
</pallas_src>

<mosaic_0001>
module attributes {stable_mosaic.version = 11 : i64} {
  func.func @_cls_head_kernel(%arg0: i32, %arg1: memref<8x128xbf16, #tpu.memory_space<vmem>>, %arg2: memref<128x128xbf16, #tpu.memory_space<vmem>>, %arg3: memref<1x128xf32, #tpu.memory_space<vmem>>, %arg4: memref<128x128xbf16, #tpu.memory_space<vmem>>, %arg5: memref<1x128xf32, #tpu.memory_space<vmem>>, %arg6: memref<8x128xf32, #tpu.memory_space<vmem>>) attributes {dimension_semantics = [#tpu.dimension_semantics<parallel>], iteration_bounds = array<i64: 1>, scalar_prefetch = 0 : i64, scratch_operands = 0 : i64, tpu.core_type = #tpu.core_type<tc>, window_params = [{transform_indices = @transform_0, window_bounds = array<i64: 8, 128>}, {pipeline_mode = #tpu.pipeline_mode<synchronous>, transform_indices = @transform_1, window_bounds = array<i64: 128, 128>}, {pipeline_mode = #tpu.pipeline_mode<synchronous>, transform_indices = @transform_2, window_bounds = array<i64: 1, 128>}, {pipeline_mode = #tpu.pipeline_mode<synchronous>, transform_indices = @transform_3, window_bounds = array<i64: 128, 128>}, {pipeline_mode = #tpu.pipeline_mode<synchronous>, transform_indices = @transform_4, window_bounds = array<i64: 1, 128>}, {transform_indices = @transform_5, window_bounds = array<i64: 8, 128>}]} {
    %c0 = arith.constant 0 : index
    %c0_0 = arith.constant 0 : index
    %0 = vector.load %arg1[%c0, %c0_0] : memref<8x128xbf16, #tpu.memory_space<vmem>>, vector<8x128xbf16>
    %c0_1 = arith.constant 0 : index
    %c0_2 = arith.constant 0 : index
    %1 = vector.load %arg2[%c0_1, %c0_2] : memref<128x128xbf16, #tpu.memory_space<vmem>>, vector<128x128xbf16>
    %cst = arith.constant dense<0.000000e+00> : vector<8x128xf32>
    %2 = tpu.matmul %0, %1, %cst {dimension_numbers = #tpu.dot_dimension_numbers<[1], [0], [0], [1], [0, 0, 1, 1], [], []>} : vector<8x128xbf16>, vector<128x128xbf16>, vector<8x128xf32> -> vector<8x128xf32>
    %c0_3 = arith.constant 0 : index
    %c0_4 = arith.constant 0 : index
    %3 = vector.load %arg3[%c0_3, %c0_4] : memref<1x128xf32, #tpu.memory_space<vmem>>, vector<1x128xf32>
    %4 = vector.broadcast %3 : vector<1x128xf32> to vector<8x128xf32>
    %5 = arith.addf %2, %4 : vector<8x128xf32>
    %6 = math.tanh %5 : vector<8x128xf32>
    %7 = arith.truncf %6 : vector<8x128xf32> to vector<8x128xbf16>
    %c0_5 = arith.constant 0 : index
    %c0_6 = arith.constant 0 : index
    %8 = vector.load %arg4[%c0_5, %c0_6] : memref<128x128xbf16, #tpu.memory_space<vmem>>, vector<128x128xbf16>
    %cst_7 = arith.constant dense<0.000000e+00> : vector<8x128xf32>
    %9 = tpu.matmul %7, %8, %cst_7 {dimension_numbers = #tpu.dot_dimension_numbers<[1], [0], [0], [1], [0, 0, 1, 1], [], []>} : vector<8x128xbf16>, vector<128x128xbf16>, vector<8x128xf32> -> vector<8x128xf32>
    %c0_8 = arith.constant 0 : index
    %c0_9 = arith.constant 0 : index
    %10 = vector.load %arg5[%c0_8, %c0_9] : memref<1x128xf32, #tpu.memory_space<vmem>>, vector<1x128xf32>
    %11 = vector.broadcast %10 : vector<1x128xf32> to vector<8x128xf32>
    %12 = arith.addf %9, %11 : vector<8x128xf32>
    %c0_10 = arith.constant 0 : index
    %c0_11 = arith.constant 0 : index
    %13 = vector.load %arg6[%c0_10, %c0_11] : memref<8x128xf32, #tpu.memory_space<vmem>>, vector<8x128xf32>
    tpu.vector_store %arg6[%c0_10, %c0_11], %12 {strides = array<i32>} : memref<8x128xf32, #tpu.memory_space<vmem>>, vector<8x128xf32>,
    return
  }
  func.func @transform_0(%arg0: i32) -> (i32, i32) {
    %c0_i32 = arith.constant 0 : i32
    %c0_i32_0 = arith.constant 0 : i32
    return %arg0, %c0_i32 : i32, i32
  }
  func.func @transform_1(%arg0: i32) -> (i32, i32) {
    %c0_i32 = arith.constant 0 : i32
    %c0_i32_0 = arith.constant 0 : i32
    %c0_i32_1 = arith.constant 0 : i32
    return %c0_i32, %c0_i32_0 : i32, i32
  }
  func.func @transform_2(%arg0: i32) -> (i32, i32) {
    %c0_i32 = arith.constant 0 : i32
    %c0_i32_0 = arith.constant 0 : i32
    %c0_i32_1 = arith.constant 0 : i32
    return %c0_i32, %c0_i32_0 : i32, i32
  }
  func.func @transform_3(%arg0: i32) -> (i32, i32) {
    %c0_i32 = arith.constant 0 : i32
    %c0_i32_0 = arith.constant 0 : i32
    %c0_i32_1 = arith.constant 0 : i32
    return %c0_i32, %c0_i32_0 : i32, i32
  }
  func.func @transform_4(%arg0: i32) -> (i32, i32) {
    %c0_i32 = arith.constant 0 : i32
    %c0_i32_0 = arith.constant 0 : i32
    %c0_i32_1 = arith.constant 0 : i32
    return %c0_i32, %c0_i32_0 : i32, i32
  }
  func.func @transform_5(%arg0: i32) -> (i32, i32) {
    %c0_i32 = arith.constant 0 : i32
    %c0_i32_0 = arith.constant 0 : i32
    return %arg0, %c0_i32 : i32, i32
  }
}

</mosaic_0001>

<bundles_post_ra>
// kernel: xlm_roberta_classification_head.1
= control target key start
LH: loop header
LB: loop body
LE: loop exit
PB: predicated region body
PF: predicated region fallthrough
CT: control target
= control target key end

     0   :  { %10 = vsyncpa [#allocation3], 0  ;;  %s501_s0 = inlined_call_operand.vmem [shape: bf16[8,128], index: 0, kind: input, shape index: {}]   ;;  %s502_s1 = inlined_call_operand.hbm [shape: bf16[128,128], index: 1, kind: input, shape index: {}]   ;;  %s503_s2 = inlined_call_operand.vmem [shape: f32[1,128], index: 2, kind: input, shape index: {}]   ;;  %s504_s3 = inlined_call_operand.hbm [shape: bf16[128,128], index: 3, kind: input, shape index: {}]   ;;  %s505_s4 = inlined_call_operand.vmem [shape: f32[1,128], index: 4, kind: input, shape index: {}]   ;;  %s506_s5 = inlined_call_operand.vmem [shape: f32[8,128], index: 5, kind: output, shape index: {}]  }
   0x1   :  { %11 = vsyncpa [#allocation5], 0  ;;  %s429_s18 = smov [#allocation2]   ;;  %s381_s22 = scalar_lea.hbm %s502_s1, 1024 }
   0x2   :  { %s19_s19 = sshll.u32 %s429_s18, 4  ;;  %p382_p0 = scmp.ne.s32.totalorder %s502_s1, %s381_s22  ;;  %s20_s19 = int_to_ptr.vmem [resolvable:$true] %s19_s19 }
   0x3   :  { %p385_p1 = scmp.lt.u32.totalorder %s381_s22, %s502_s1 }
   0x5   :  { %p387_p2 = pnand %p385_p1, %p382_p0 }
   0x7   :  { %390 = shalt.err (!%p387_p2)
}
   0x8   :  { %s391_s27 = scalar_lea.vmem %s20_s19, 1024  ;;  %p396_p4 = scmp.lt.s32.totalorder %s20_s19, %s20_s19 }
   0x9   :  { %p392_p3 = scmp.ne.s32.totalorder %s20_s19, %s391_s27  ;;  %p397_p5 = scmp.lt.s32.totalorder %s391_s27, %s391_s27 }
   0xb   :  { %p398_p6 = por %p397_p5, %p396_p4 }
   0xd   :  { %p399_p7 = pnand %p398_p6, %p392_p3 }
   0xf   :  { %402 = shalt.err (!%p399_p7)
}
  0x10   :  { %s430_s28 = smov 64   ;;  %s431_s29 = smov 4  }
  0x11   :  { %25 = dma.hbm_to_vmem [thread:$0]  %s502_s1, 1024, %s20_s19, [#allocation3], %s430_s28, %s430_s28, %s431_s29  }
  0x12   :  { %s432_s7 = smov [#allocation4]   ;;  %s403_s11 = scalar_lea.hbm %s504_s3, 1024 }
  0x13   :  { %s33_s8 = sshll.u32 %s432_s7, 4  ;;  %p404_p8 = scmp.ne.s32.totalorder %s504_s3, %s403_s11  ;;  %s34_s8 = int_to_ptr.vmem [resolvable:$true] %s33_s8 }
  0x14   :  { %p407_p9 = scmp.lt.u32.totalorder %s403_s11, %s504_s3 }
  0x16   :  { %p409_p10 = pnand %p407_p9, %p404_p8 }
  0x18   :  { %412 = shalt.err (!%p409_p10)
}
  0x19   :  { %s413_s16 = scalar_lea.vmem %s34_s8, 1024  ;;  %p418_p12 = scmp.lt.s32.totalorder %s34_s8, %s34_s8 }
  0x1a   :  { %p414_p11 = scmp.ne.s32.totalorder %s34_s8, %s413_s16  ;;  %p419_p13 = scmp.lt.s32.totalorder %s413_s16, %s413_s16 }
  0x1c   :  { %p420_p0 = por %p419_p13, %p418_p12 }
  0x1e   :  { %p421_p1 = pnand %p420_p0, %p414_p11 }
  0x20   :  { %424 = shalt.err (!%p421_p1)
}
  0x21   :  { %39 = dma.hbm_to_vmem [thread:$0]  %s504_s3, 1024, %s34_s8, [#allocation5], %s430_s28, %s430_s28, %s431_s29  }
  0x22   :  { %425 = dma.done.wait [#allocation3], 1024  }
  0x23   :  { %426 = vsyncadd [#allocation3], 4294966272 }
  0x24   :  { %427 = dma.done.wait [#allocation5], 1024  }
  0x25   :  { %428 = vsyncadd [#allocation5], 4294966272  ;;  %v433_v0 = vmov 0.0   ;;  %vm434_vm0 = vmmov 0   ;;  %v363_v1 = vld [vmem:[#allocation2] sm:$0xff]   ;;  %v364_v2 = vld [vmem:[#allocation2 + $0x8] sm:$0xff]  }
  0x26   :  { %317 = vmatprep.subr.bf16.mxu0 %v433_v0  ;;  %333 = vmatprep.mubr.msk.bf16.mxu0 %vm434_vm0, %v433_v0  ;;  %v365_v3 = vld [vmem:[#allocation2 + $0x10] sm:$0xff]   ;;  %v371_v4 = vld [vmem:[#allocation4] sm:$0xff]   ;;  %v366_v5 = vld [vmem:[#allocation2 + $0x18] sm:$0xff]  }
  0x27   :  { %337 = vmatprep.subr.bf16.mxu1 %v433_v0  ;;  %353 = vmatprep.mubr.msk.bf16.mxu1 %vm434_vm0, %v433_v0  ;;  %v372_v6 = vld [vmem:[#allocation4 + $0x8] sm:$0xff]   ;;  %v367_v7 = vld [vmem:[#allocation2 + $0x20] sm:$0xff]   ;;  %v373_v8 = vld [vmem:[#allocation4 + $0x10] sm:$0xff]  }
  0x28   :  { %318 = vmatpush3.bf16.msra.mxu0 %v363_v1  ;;  %338 = vmatpush3.bf16.msra.mxu1 %v371_v4  ;;  %v368_v9 = vld [vmem:[#allocation2 + $0x28] sm:$0xff]   ;;  %v374_v10 = vld [vmem:[#allocation4 + $0x18] sm:$0xff]   ;;  %v369_v11 = vld [vmem:[#allocation2 + $0x30] sm:$0xff]  }
  0x29   :  { %319 = vmatprep.subr.bf16.mxu0 %v433_v0  ;;  %339 = vmatprep.subr.bf16.mxu1 %v433_v0  ;;  %v370_v12 = vld [vmem:[#allocation2 + $0x38] sm:$0xff]   ;;  %v49_v13 = vld [vmem:[%s501_s0] sm:$0xf]  ;;  %v376_v15 = vld [vmem:[#allocation4 + $0x28] sm:$0xff]  }
  0x2a   :  { %v375_v14 = vld [vmem:[#allocation4 + $0x20] sm:$0xff]   ;;  %v377_v16 = vld [vmem:[#allocation4 + $0x30] sm:$0xff]   ;;  %v378_v17 = vld [vmem:[#allocation4 + $0x38] sm:$0xff]  }
  0x2b   :  { %v281_v18 = vld [vmem:[%s503_s2] ss:$0 sm:$0xff] }
  0x2c   :  { %320 = vmatpush3.bf16.msra.mxu0 %v364_v2  ;;  %340 = vmatpush3.bf16.msra.mxu1 %v372_v6  ;;  %v290_v26 = vld [vmem:[%s505_s4] ss:$0 sm:$0xff] }
  0x2d   :  { %321 = vmatprep.subr.bf16.mxu0 %v433_v0  ;;  %341 = vmatprep.subr.bf16.mxu1 %v433_v0 }
  0x30   :  { %322 = vmatpush3.bf16.msra.mxu0 %v365_v3  ;;  %342 = vmatpush3.bf16.msra.mxu1 %v373_v8 }
  0x31   :  { %323 = vmatprep.subr.bf16.mxu0 %v433_v0  ;;  %343 = vmatprep.subr.bf16.mxu1 %v433_v0 }
  0x34   :  { %324 = vmatpush3.bf16.msra.mxu0 %v366_v5  ;;  %344 = vmatpush3.bf16.msra.mxu1 %v374_v10 }
  0x35   :  { %325 = vmatprep.subr.bf16.mxu0 %v433_v0  ;;  %345 = vmatprep.subr.bf16.mxu1 %v433_v0 }
  0x38   :  { %326 = vmatpush3.bf16.msra.mxu0 %v367_v7  ;;  %346 = vmatpush3.bf16.msra.mxu1 %v375_v14 }
  0x39   :  { %327 = vmatprep.subr.bf16.mxu0 %v433_v0  ;;  %347 = vmatprep.subr.bf16.mxu1 %v433_v0 }
  0x3c   :  { %328 = vmatpush3.bf16.msra.mxu0 %v368_v9  ;;  %348 = vmatpush3.bf16.msra.mxu1 %v376_v15 }
  0x3d   :  { %329 = vmatprep.subr.bf16.mxu0 %v433_v0  ;;  %349 = vmatprep.subr.bf16.mxu1 %v433_v0 }
  0x40   :  { %330 = vmatpush3.bf16.msra.mxu0 %v369_v11  ;;  %350 = vmatpush3.bf16.msra.mxu1 %v377_v16 }
  0x41   :  { %331 = vmatprep.subr.bf16.mxu0 %v433_v0  ;;  %351 = vmatprep.subr.bf16.mxu1 %v433_v0 }
  0x44   :  { %332 = vmatpush3.bf16.msra.mxu0 %v370_v12  ;;  %352 = vmatpush3.bf16.msra.mxu1 %v378_v17 }
  0x47   :  { %334 = vmatmul.mubr.bf16.vlgmr.msra.gmra.mrb[0].mxu0 %v49_v13 }
 0x11a   :  { %v155_v19 = vpop.f32.mrb[0].mxu0 }
 0x11b   :  { %v156_v20 = vadd.f32 %v281_v18, %v155_v19  ;;  %v335_v21 = vpop.f32.mrb[1].mxu0 }
 0x11c   :  { %v158_v22 = vpop.f32.mrb[2].mxu0 }
 0x11d   :  { %379 = vtanh.f32 %v156_v20  ;;  %v336_v23 = vpop.f32.mrb[3].mxu0 }
 0x127   :  { %v380_v24 = vpop.eup %379 }
 0x128   :  { %v162_v25 = vpack.c.bf16 %v380_v24, %v380_v24 }
 0x12a   :  { %354 = vmatmul.mubr.bf16.vlgmr.msra.gmra.mrb[0].mxu1 %v162_v25 }
 0x1fd   :  { %v268_v27 = vpop.f32.mrb[0].mxu1 }
 0x1fe   :  { %v269_v28 = vadd.f32 %v290_v26, %v268_v27  ;;  %v355_v29 = vpop.f32.mrb[1].mxu1 }
 0x1ff   :  { %v271_v30 = vpop.f32.mrb[2].mxu1 }
 0x200   :  { %274 = vst [vmem:[%s506_s5] sm:$0xff] %v269_v28  ;;  %v356_v31 = vpop.f32.mrb[3].mxu1 }
 0x201   :  { %279 = vsyncpa [#allocation3], 1 }
 0x202   :  { %280 = vsyncpa [#allocation5], 1 }

</bundles_post_ra>
